<compile_context>
chip_gen: v6e
topology: v6e:2x2x1
jax: 0.10.0
libtpu: 0.0.40
codegen_flags: <defaults>
</compile_context>

<pallas_src>
import jax
import jax.numpy as jnp
from jax.experimental import pallas as pl
from jax.experimental.pallas import tpu as pltpu


# -----------------------------------------------------------------------------
# Fused kernel
# -----------------------------------------------------------------------------
def _make_tcn_kernel(layer_cfgs, L, lane, compute_dtype):
    """Build the fused TCN kernel (all static config baked in).

    Activations inside the kernel have shape (channels, lane) with
    lane = b_blk * L; sample b of the tile occupies lanes [b*L, (b+1)*L).
    """

    def _first_col_bcast(a, pos, needed):
        # Broadcast each sample's first column to all positions pos < `needed`
        # via prefix-doubling (log2(needed) rolls + selects, XLU/VPU only).
        f = jnp.where(pos == 0, a, 0.0)
        cov = 1
        while cov < needed:
            f = f + jnp.where(pos >= cov, pltpu.roll(f, cov, axis=1), 0.0)
            cov *= 2
        return f

    def _im2col(a, pos, k, dil, pad):
        # Stack the k dilated taps of the causal conv on the sublane axis.
        # Tap t needs a right-shift by s=(k-1-t)*dil with replicate ("edge")
        # left padding -> roll along lanes + select the sample's first column
        # in the first s positions of every sample.
        if k == 1:
            return a
        firsts = _first_col_bcast(a, pos, min(pad, L))
        taps = []
        for t in range(k):
            s = (k - 1 - t) * dil
            if s == 0:
                taps.append(a)                       # last tap == a (no shift)
            elif s >= L:
                taps.append(firsts)                  # whole sample is pad region
            else:
                taps.append(jnp.where(pos >= s, pltpu.roll(a, s, axis=1), firsts))
        return jnp.concatenate(taps, axis=0)         # (k*c_in, lane)

    def kernel(x_ref, *rest):
        out_ref = rest[-1]
        wrefs = rest[:-1]

        # position within sample for every lane of this batch tile
        pos = jax.lax.broadcasted_iota(jnp.int32, (1, lane), 1) % L

        h = x_ref[...].astype(jnp.float32)           # (cin0, lane)

        wi = 0
        for cfg in layer_cfgs:
            cout, k, dil, pad, has_ds = (cfg["cout"], cfg["k"], cfg["dil"],
                                         cfg["pad"], cfg["has_ds"])
            w1f_ref, b1f_ref, w2_ref, b2_ref = wrefs[wi:wi + 4]
            wi += 4

            # ---- conv1 (+ fused 1x1 downsample rows): ONE MXU matmul -------
            im1 = _im2col(h, pos, k, dil, pad).astype(compute_dtype)
            z1 = jnp.dot(w1f_ref[...], im1,
                         preferred_element_type=jnp.float32) + b1f_ref[...]
            if has_ds:
                h1 = jnp.maximum(z1[:cout], 0.0)     # conv1 -> chomp -> relu
                res = z1[cout:]                      # downsample(x) (no relu)
            else:
                h1 = jnp.maximum(z1, 0.0)
                res = h
            # dropout1: identity (inference semantics)

            # ---- conv2: ONE MXU matmul -------------------------------------
            im2 = _im2col(h1, pos, k, dil, pad).astype(compute_dtype)
            h2 = jnp.maximum(
                jnp.dot(w2_ref[...], im2,
                        preferred_element_type=jnp.float32) + b2_ref[...], 0.0)
            # dropout2: identity (inference semantics)
            # TODO(synk): nn.Dropout train-mode masking not reproduced
            # (treated as eval/identity).

            h = jnp.maximum(h2 + res, 0.0)           # residual add + final ReLU

        out_ref[...] = h.astype(out_ref.dtype)       # full-lane-width store

    return kernel


# -----------------------------------------------------------------------------
# Batch-tile selection: lane width multiple of 128, VMEM-bounded, grid >= 2
# -----------------------------------------------------------------------------
def _pick_b_blk(B, L, bytes_per_lane, act_budget=24 * 2**20):
    divs = [d for d in range(1, B + 1) if B % d == 0]
    cands = [d for d in divs
             if (d * L) % 128 == 0 and d * L * bytes_per_lane <= act_budget]
    if not cands:
        # Only the full extent is a legal (non-128-multiple) lane block.
        return B

    def score(d):
        lane = d * L
        return (512 <= lane <= 2048,      # prefer wide lane columns
                (B // d) >= 2,            # keep >= 2 grid steps (v7x: 2 TCs)
                -abs(lane - 1024))
    return max(cands, key=score)


# -----------------------------------------------------------------------------
# Wrapper
# -----------------------------------------------------------------------------
def temporal_conv_net(x, params, kernel_size, *, use_bf16_matmul=False):
    """Fused TCN forward: x (B, cin0, L) -> (B, cout_last, L)."""
    B, cin0, L = map(int, x.shape)
    k = int(kernel_size)
    compute_dtype = jnp.bfloat16 if use_bf16_matmul else jnp.float32

    # ---- static per-layer config ------------------------------------------
    layer_cfgs = []
    cin = cin0
    max_rows = cin0
    for i, p in enumerate(params):
        cout = int(p["w1"].shape[0])
        dil = 2 ** i
        pad = (k - 1) * dil
        has_ds = (cin != cout)
        layer_cfgs.append(dict(cin=cin, cout=cout, k=k, dil=dil, pad=pad,
                               has_ds=has_ds))
        max_rows = max(max_rows, k * cin, k * cout, 2 * cout)
        cin = cout
    cout_last = cin

    # ---- batch tile ----------------------------------------------------------
    bytes_per_lane = 4 * (2 * (cin0 + cout_last) + 10 * max_rows)
    b_blk = _pick_b_blk(B, L, bytes_per_lane)
    lane = b_blk * L
    n_blocks = B // b_blk

    # ---- lane-dense input layout: (C, B*L), samples contiguous along lanes --
    xt = jnp.transpose(x, (1, 0, 2)).reshape(cin0, B * L).astype(jnp.float32)

    # ---- weight packing ------------------------------------------------------
    weight_arrays = []
    weight_specs = []
    for cfg, p in zip(layer_cfgs, params):
        cin_l, cout = cfg["cin"], cfg["cout"]
        # (cout, cin, k) -> (cout, k*cin), column block t holds tap t
        # (matches the in-kernel im2col sublane-block ordering).
        w1m = jnp.transpose(p["w1"], (0, 2, 1)).reshape(cout, k * cin_l)
        w2m = jnp.transpose(p["w2"], (0, 2, 1)).reshape(cout, k * cout)
        b1c = p["b1"].reshape(cout, 1).astype(jnp.float32)
        b2c = p["b2"].reshape(cout, 1).astype(jnp.float32)
        if cfg["has_ds"]:
            # Fuse downsample (1x1 conv) into conv1: the LAST im2col tap block
            # equals the layer input, so wd becomes extra output rows with
            # zeros in all other tap columns.
            wd = p["wd"].reshape(cout, cin_l).astype(jnp.float32)
            w_res = jnp.concatenate(
                [jnp.zeros((cout, (k - 1) * cin_l), jnp.float32), wd], axis=1)
            w1f = jnp.concatenate([w1m, w_res], axis=0)        # (2*cout, k*cin)
            b1f = jnp.concatenate(
                [b1c, p["bd"].reshape(cout, 1).astype(jnp.float32)], axis=0)
        else:
            w1f, b1f = w1m, b1c

        for arr in (w1f.astype(compute_dtype), b1f,
                    w2m.astype(compute_dtype), b2c):
            weight_arrays.append(arr)
            # Full-array block, constant index map -> resident across steps.
            weight_specs.append(pl.BlockSpec(arr.shape, lambda i: (0, 0)))

    # ---- scoped-VMEM limit (v5e's 16 MiB default is too small once lane grows)
    est = 4 * lane * (2 * (cin0 + cout_last) + 10 * max_rows)
    est += 2 * sum(int(a.size) * a.dtype.itemsize for a in weight_arrays)
    vmem_limit = int(min(max(2 * est, 32 * 2**20), 48 * 2**20))

    kernel = _make_tcn_kernel(layer_cfgs, L, lane, compute_dtype)

    out2d = pl.pallas_call(
        kernel,
        out_shape=jax.ShapeDtypeStruct((cout_last, B * L), jnp.float32),
        grid=(n_blocks,),
        in_specs=[pl.BlockSpec((cin0, lane), lambda i: (0, i))] + weight_specs,
        out_specs=pl.BlockSpec((cout_last, lane), lambda i: (0, i)),
        compiler_params=pltpu.CompilerParams(
            dimension_semantics=("parallel",),
            vmem_limit_bytes=vmem_limit),
    )(xt, *weight_arrays)

    # back to the module's (B, C, L) layout
    return jnp.transpose(out2d.reshape(cout_last, B, L), (1, 0, 2))


# -----------------------------------------------------------------------------
# Parameter init mirroring TemporalBlock.__init__
# (torch weight_norm(dim=0): w = g*v/||v|| with g initialised to ||v||, so the
#  effective weight at init equals the raw normal(0, 0.01) sample.)
# -----------------------------------------------------------------------------
def init_tcn_params(key, num_inputs, num_channels, kernel_size):
    params = []
    cin = num_inputs
    for cout in num_channels:
        key, k1, k2, k3, k4, k5, k6 = jax.random.split(key, 7)
        p = {
            "w1": jax.random.normal(k1, (cout, cin, kernel_size), jnp.float32) * 0.01,
            "b1": jax.random.normal(k2, (cout,), jnp.float32) * 0.1,
            "w2": jax.random.normal(k3, (cout, cout, kernel_size), jnp.float32) * 0.01,
            "b2": jax.random.normal(k4, (cout,), jnp.float32) * 0.1,
        }
        if cin != cout:  # downsample = Conv1d(cin, cout, 1)
            p["wd"] = jax.random.normal(k5, (cout, cin, 1), jnp.float32) * 0.01
            p["bd"] = jax.random.normal(k6, (cout,), jnp.float32) * 0.1
        params.append(p)
        cin = cout
    return params


# -----------------------------------------------------------------------------
# Pure-JAX reference (natural layout, no Pallas) for the correctness check
# -----------------------------------------------------------------------------
def _causal_conv_ref(x, w, b, dilation):
    # Conv1d(padding=(k-1)*d, dilation=d, padding_mode='replicate') + Chomp1d
    # == causal conv with replicate LEFT padding of (k-1)*d.
    k = w.shape[2]
    pad = (k - 1) * dilation
    L = x.shape[2]
    xp = jnp.pad(x, ((0, 0), (0, 0), (pad, 0)), mode="edge")
    out = jnp.zeros((x.shape[0], w.shape[0], L), jnp.float32)
    for t in range(k):
        out = out + jnp.einsum("oc,bcl->bol", w[:, :, t],
                               xp[:, :, t * dilation:t * dilation + L])
    return out + b[None, :, None]


def tcn_reference(x, params, kernel_size):
    h = x.astype(jnp.float32)
    for i, p in enumerate(params):
        dil = 2 ** i
        h1 = jax.nn.relu(_causal_conv_ref(h, p["w1"], p["b1"], dil))
        h2 = jax.nn.relu(_causal_conv_ref(h1, p["w2"], p["b2"], dil))
        if "wd" in p:
            res = jnp.einsum("oc,bcl->bol", p["wd"][:, :, 0], h) + p["bd"][None, :, None]
        else:
            res = h
        h = jax.nn.relu(h2 + res)
    return h


if __name__ == "__main__":
    key = jax.random.PRNGKey(0)
    B, C_in, L = 16, 4, 16
    num_channels = [8, 8]          # two TemporalBlocks, dilations 1 and 2
    kernel_size = 2

    kx, kp = jax.random.split(key)
    x = jax.random.normal(kx, (B, C_in, L), jnp.float32)
    params = init_tcn_params(kp, C_in, num_channels, kernel_size)

    out = jax.block_until_ready(temporal_conv_net(x, params, kernel_size))
    ref = tcn_reference(x, params, kernel_size)

    assert out.shape == (B, num_channels[-1], L), out.shape
    assert bool(jnp.all(jnp.isfinite(out)))
    assert bool(jnp.allclose(out, ref, rtol=1e-5, atol=1e-5)), \
        float(jnp.max(jnp.abs(out - ref)))
    print("KERNEL_OK")
</pallas_src>

<mosaic_0001>
module attributes {stable_mosaic.version = 11 : i64} {
  func.func @kernel(%arg0: i32, %arg1: memref<4x128xf32, #tpu.memory_space<vmem>>, %arg2: memref<16x8xf32, #tpu.memory_space<vmem>>, %arg3: memref<16x1xf32, #tpu.memory_space<vmem>>, %arg4: memref<8x16xf32, #tpu.memory_space<vmem>>, %arg5: memref<8x1xf32, #tpu.memory_space<vmem>>, %arg6: memref<8x16xf32, #tpu.memory_space<vmem>>, %arg7: memref<8x1xf32, #tpu.memory_space<vmem>>, %arg8: memref<8x16xf32, #tpu.memory_space<vmem>>, %arg9: memref<8x1xf32, #tpu.memory_space<vmem>>, %arg10: memref<8x128xf32, #tpu.memory_space<vmem>>) attributes {dimension_semantics = [#tpu.dimension_semantics<parallel>], iteration_bounds = array<i64: 2>, scalar_prefetch = 0 : i64, scratch_operands = 0 : i64, tpu.core_type = #tpu.core_type<tc>, window_params = [{transform_indices = @transform_0, window_bounds = array<i64: 4, 128>}, {pipeline_mode = #tpu.pipeline_mode<synchronous>, transform_indices = @transform_1, window_bounds = array<i64: 16, 8>}, {pipeline_mode = #tpu.pipeline_mode<synchronous>, transform_indices = @transform_2, window_bounds = array<i64: 16, 1>}, {pipeline_mode = #tpu.pipeline_mode<synchronous>, transform_indices = @transform_3, window_bounds = array<i64: 8, 16>}, {pipeline_mode = #tpu.pipeline_mode<synchronous>, transform_indices = @transform_4, window_bounds = array<i64: 8, 1>}, {pipeline_mode = #tpu.pipeline_mode<synchronous>, transform_indices = @transform_5, window_bounds = array<i64: 8, 16>}, {pipeline_mode = #tpu.pipeline_mode<synchronous>, transform_indices = @transform_6, window_bounds = array<i64: 8, 1>}, {pipeline_mode = #tpu.pipeline_mode<synchronous>, transform_indices = @transform_7, window_bounds = array<i64: 8, 16>}, {pipeline_mode = #tpu.pipeline_mode<synchronous>, transform_indices = @transform_8, window_bounds = array<i64: 8, 1>}, {transform_indices = @transform_9, window_bounds = array<i64: 8, 128>}]} {
    %0 = tpu.iota {dimensions = array<i32: 1>} : vector<1x128xi32>
    %c16_i32 = arith.constant 16 : i32
    %c0_i32 = arith.constant 0 : i32
    %1 = arith.cmpi eq, %c16_i32, %c0_i32 : i32
    %c1_i32 = arith.constant 1 : i32
    %2 = arith.select %1, %c1_i32, %c16_i32 : i32
    %3 = vector.broadcast %2 : i32 to vector<1x128xi32>
    %4 = arith.remsi %0, %3 : vector<1x128xi32>
    %c0_i32_0 = arith.constant 0 : i32
    %5 = vector.broadcast %c0_i32_0 : i32 to vector<1x128xi32>
    %6 = arith.cmpi ne, %4, %5 : vector<1x128xi32>
    %c0_i32_1 = arith.constant 0 : i32
    %7 = vector.broadcast %c0_i32_1 : i32 to vector<1x128xi32>
    %8 = arith.cmpi slt, %4, %7 : vector<1x128xi32>
    %c0_i32_2 = arith.constant 0 : i32
    %9 = arith.cmpi slt, %2, %c0_i32_2 : i32
    %10 = vector.broadcast %9 : i1 to vector<1x128xi1>
    %11 = vector.broadcast %10 : vector<1x128xi1> to vector<1x128xi1>
    %12 = arith.xori %8, %11 : vector<1x128xi1>
    %13 = arith.andi %12, %6 : vector<1x128xi1>
    %14 = vector.broadcast %2 : i32 to vector<1x128xi32>
    %15 = arith.addi %4, %14 : vector<1x128xi32>
    %16 = arith.select %13, %15, %4 : vector<1x128xi1>, vector<1x128xi32>
    %c0 = arith.constant 0 : index
    %c0_3 = arith.constant 0 : index
    %17 = vector.load %arg1[%c0, %c0_3] : memref<4x128xf32, #tpu.memory_space<vmem>>, vector<4x128xf32>
    %c0_i32_4 = arith.constant 0 : i32
    %18 = vector.broadcast %c0_i32_4 : i32 to vector<1x128xi32>
    %19 = arith.cmpi eq, %16, %18 : vector<1x128xi32>
    %cst = arith.constant 0.000000e+00 : f32
    %20 = vector.shape_cast %19 : vector<1x128xi1> to vector<1x128xi1>
    %21 = vector.broadcast %20 : vector<1x128xi1> to vector<4x128xi1>
    %22 = vector.broadcast %cst : f32 to vector<4x128xf32>
    %23 = arith.select %21, %17, %22 : vector<4x128xi1>, vector<4x128xf32>
    %c1_i32_5 = arith.constant 1 : i32
    %24 = vector.broadcast %c1_i32_5 : i32 to vector<1x128xi32>
    %25 = arith.cmpi sge, %16, %24 : vector<1x128xi32>
    %c1_i32_6 = arith.constant 1 : i32
    %26 = tpu.dynamic_rotate %17 by %c1_i32_6 dim 1 : vector<4x128xf32>, i32 -> vector<4x128xf32>
    %27 = vector.shape_cast %25 : vector<1x128xi1> to vector<1x128xi1>
    %28 = vector.broadcast %27 : vector<1x128xi1> to vector<4x128xi1>
    %29 = arith.select %28, %26, %23 : vector<4x128xi1>, vector<4x128xf32>
    %30 = tpu.concatenate %29, %17 in 0 : vector<4x128xf32>, vector<4x128xf32> -> vector<8x128xf32>
    %c0_7 = arith.constant 0 : index
    %c0_8 = arith.constant 0 : index
    %31 = vector.load %arg2[%c0_7, %c0_8] : memref<16x8xf32, #tpu.memory_space<vmem>>, vector<16x8xf32>
    %cst_9 = arith.constant dense<0.000000e+00> : vector<16x128xf32>
    %32 = tpu.matmul %31, %30, %cst_9 {dimension_numbers = #tpu.dot_dimension_numbers<[1], [0], [0], [1], [0, 0, 1, 1], [], []>} : vector<16x8xf32>, vector<8x128xf32>, vector<16x128xf32> -> vector<16x128xf32>
    %c0_10 = arith.constant 0 : index
    %c0_11 = arith.constant 0 : index
    %33 = vector.load %arg3[%c0_10, %c0_11] : memref<16x1xf32, #tpu.memory_space<vmem>>, vector<16x1xf32>
    %34 = vector.broadcast %33 : vector<16x1xf32> to vector<16x128xf32>
    %35 = arith.addf %32, %34 : vector<16x128xf32>
    %36 = vector.extract_strided_slice %35 {offsets = [0, 0], sizes = [8, 128], strides = [1, 1]} : vector<16x128xf32> to vector<8x128xf32>
    %cst_12 = arith.constant 0.000000e+00 : f32
    %37 = vector.broadcast %cst_12 : f32 to vector<8x128xf32>
    %38 = arith.maximumf %36, %37 : vector<8x128xf32>
    %39 = vector.extract_strided_slice %35 {offsets = [8, 0], sizes = [8, 128], strides = [1, 1]} : vector<16x128xf32> to vector<8x128xf32>
    %c0_i32_13 = arith.constant 0 : i32
    %40 = vector.broadcast %c0_i32_13 : i32 to vector<1x128xi32>
    %41 = arith.cmpi eq, %16, %40 : vector<1x128xi32>
    %cst_14 = arith.constant 0.000000e+00 : f32
    %42 = vector.shape_cast %41 : vector<1x128xi1> to vector<1x128xi1>
    %43 = vector.broadcast %42 : vector<1x128xi1> to vector<8x128xi1>
    %44 = vector.broadcast %cst_14 : f32 to vector<8x128xf32>
    %45 = arith.select %43, %38, %44 : vector<8x128xi1>, vector<8x128xf32>
    %c1_i32_15 = arith.constant 1 : i32
    %46 = vector.broadcast %c1_i32_15 : i32 to vector<1x128xi32>
    %47 = arith.cmpi sge, %16, %46 : vector<1x128xi32>
    %c1_i32_16 = arith.constant 1 : i32
    %48 = tpu.dynamic_rotate %38 by %c1_i32_16 dim 1 : vector<8x128xf32>, i32 -> vector<8x128xf32>
    %49 = vector.shape_cast %47 : vector<1x128xi1> to vector<1x128xi1>
    %50 = vector.broadcast %49 : vector<1x128xi1> to vector<8x128xi1>
    %51 = arith.select %50, %48, %45 : vector<8x128xi1>, vector<8x128xf32>
    %52 = tpu.concatenate %51, %38 in 0 : vector<8x128xf32>, vector<8x128xf32> -> vector<16x128xf32>
    %c0_17 = arith.constant 0 : index
    %c0_18 = arith.constant 0 : index
    %53 = vector.load %arg4[%c0_17, %c0_18] : memref<8x16xf32, #tpu.memory_space<vmem>>, vector<8x16xf32>
    %cst_19 = arith.constant dense<0.000000e+00> : vector<8x128xf32>
    %54 = tpu.matmul %53, %52, %cst_19 {dimension_numbers = #tpu.dot_dimension_numbers<[1], [0], [0], [1], [0, 0, 1, 1], [], []>} : vector<8x16xf32>, vector<16x128xf32>, vector<8x128xf32> -> vector<8x128xf32>
    %c0_20 = arith.constant 0 : index
    %c0_21 = arith.constant 0 : index
    %55 = vector.load %arg5[%c0_20, %c0_21] : memref<8x1xf32, #tpu.memory_space<vmem>>, vector<8x1xf32>
    %56 = vector.broadcast %55 : vector<8x1xf32> to vector<8x128xf32>
    %57 = arith.addf %54, %56 : vector<8x128xf32>
    %cst_22 = arith.constant 0.000000e+00 : f32
    %58 = vector.broadcast %cst_22 : f32 to vector<8x128xf32>
    %59 = arith.maximumf %57, %58 : vector<8x128xf32>
    %60 = arith.addf %59, %39 : vector<8x128xf32>
    %cst_23 = arith.constant 0.000000e+00 : f32
    %61 = vector.broadcast %cst_23 : f32 to vector<8x128xf32>
    %62 = arith.maximumf %60, %61 : vector<8x128xf32>
    %c0_i32_24 = arith.constant 0 : i32
    %63 = vector.broadcast %c0_i32_24 : i32 to vector<1x128xi32>
    %64 = arith.cmpi eq, %16, %63 : vector<1x128xi32>
    %cst_25 = arith.constant 0.000000e+00 : f32
    %65 = vector.shape_cast %64 : vector<1x128xi1> to vector<1x128xi1>
    %66 = vector.broadcast %65 : vector<1x128xi1> to vector<8x128xi1>
    %67 = vector.broadcast %cst_25 : f32 to vector<8x128xf32>
    %68 = arith.select %66, %62, %67 : vector<8x128xi1>, vector<8x128xf32>
    %c1_i32_26 = arith.constant 1 : i32
    %69 = vector.broadcast %c1_i32_26 : i32 to vector<1x128xi32>
    %70 = arith.cmpi sge, %16, %69 : vector<1x128xi32>
    %c1_i32_27 = arith.constant 1 : i32
    %71 = tpu.dynamic_rotate %68 by %c1_i32_27 dim 1 : vector<8x128xf32>, i32 -> vector<8x128xf32>
    %cst_28 = arith.constant 0.000000e+00 : f32
    %72 = vector.shape_cast %70 : vector<1x128xi1> to vector<1x128xi1>
    %73 = vector.broadcast %72 : vector<1x128xi1> to vector<8x128xi1>
    %74 = vector.broadcast %cst_28 : f32 to vector<8x128xf32>
    %75 = arith.select %73, %71, %74 : vector<8x128xi1>, vector<8x128xf32>
    %76 = arith.addf %68, %75 : vector<8x128xf32>
    %c2_i32 = arith.constant 2 : i32
    %77 = vector.broadcast %c2_i32 : i32 to vector<1x128xi32>
    %78 = arith.cmpi sge, %16, %77 : vector<1x128xi32>
    %c2_i32_29 = arith.constant 2 : i32
    %79 = tpu.dynamic_rotate %62 by %c2_i32_29 dim 1 : vector<8x128xf32>, i32 -> vector<8x128xf32>
    %80 = vector.shape_cast %78 : vector<1x128xi1> to vector<1x128xi1>
    %81 = vector.broadcast %80 : vector<1x128xi1> to vector<8x128xi1>
    %82 = arith.select %81, %79, %76 : vector<8x128xi1>, vector<8x128xf32>
    %83 = tpu.concatenate %82, %62 in 0 : vector<8x128xf32>, vector<8x128xf32> -> vector<16x128xf32>
    %c0_30 = arith.constant 0 : index
    %c0_31 = arith.constant 0 : index
    %84 = vector.load %arg6[%c0_30, %c0_31] : memref<8x16xf32, #tpu.memory_space<vmem>>, vector<8x16xf32>
    %cst_32 = arith.constant dense<0.000000e+00> : vector<8x128xf32>
    %85 = tpu.matmul %84, %83, %cst_32 {dimension_numbers = #tpu.dot_dimension_numbers<[1], [0], [0], [1], [0, 0, 1, 1], [], []>} : vector<8x16xf32>, vector<16x128xf32>, vector<8x128xf32> -> vector<8x128xf32>
    %c0_33 = arith.constant 0 : index
    %c0_34 = arith.constant 0 : index
    %86 = vector.load %arg7[%c0_33, %c0_34] : memref<8x1xf32, #tpu.memory_space<vmem>>, vector<8x1xf32>
    %87 = vector.broadcast %86 : vector<8x1xf32> to vector<8x128xf32>
    %88 = arith.addf %85, %87 : vector<8x128xf32>
    %cst_35 = arith.constant 0.000000e+00 : f32
    %89 = vector.broadcast %cst_35 : f32 to vector<8x128xf32>
    %90 = arith.maximumf %88, %89 : vector<8x128xf32>
    %c0_i32_36 = arith.constant 0 : i32
    %91 = vector.broadcast %c0_i32_36 : i32 to vector<1x128xi32>
    %92 = arith.cmpi eq, %16, %91 : vector<1x128xi32>
    %cst_37 = arith.constant 0.000000e+00 : f32
    %93 = vector.shape_cast %92 : vector<1x128xi1> to vector<1x128xi1>
    %94 = vector.broadcast %93 : vector<1x128xi1> to vector<8x128xi1>
    %95 = vector.broadcast %cst_37 : f32 to vector<8x128xf32>
    %96 = arith.select %94, %90, %95 : vector<8x128xi1>, vector<8x128xf32>
    %c1_i32_38 = arith.constant 1 : i32
    %97 = vector.broadcast %c1_i32_38 : i32 to vector<1x128xi32>
    %98 = arith.cmpi sge, %16, %97 : vector<1x128xi32>
    %c1_i32_39 = arith.constant 1 : i32
    %99 = tpu.dynamic_rotate %96 by %c1_i32_39 dim 1 : vector<8x128xf32>, i32 -> vector<8x128xf32>
    %cst_40 = arith.constant 0.000000e+00 : f32
    %100 = vector.shape_cast %98 : vector<1x128xi1> to vector<1x128xi1>
    %101 = vector.broadcast %100 : vector<1x128xi1> to vector<8x128xi1>
    %102 = vector.broadcast %cst_40 : f32 to vector<8x128xf32>
    %103 = arith.select %101, %99, %102 : vector<8x128xi1>, vector<8x128xf32>
    %104 = arith.addf %96, %103 : vector<8x128xf32>
    %c2_i32_41 = arith.constant 2 : i32
    %105 = vector.broadcast %c2_i32_41 : i32 to vector<1x128xi32>
    %106 = arith.cmpi sge, %16, %105 : vector<1x128xi32>
    %c2_i32_42 = arith.constant 2 : i32
    %107 = tpu.dynamic_rotate %90 by %c2_i32_42 dim 1 : vector<8x128xf32>, i32 -> vector<8x128xf32>
    %108 = vector.shape_cast %106 : vector<1x128xi1> to vector<1x128xi1>
    %109 = vector.broadcast %108 : vector<1x128xi1> to vector<8x128xi1>
    %110 = arith.select %109, %107, %104 : vector<8x128xi1>, vector<8x128xf32>
    %111 = tpu.concatenate %110, %90 in 0 : vector<8x128xf32>, vector<8x128xf32> -> vector<16x128xf32>
    %c0_43 = arith.constant 0 : index
    %c0_44 = arith.constant 0 : index
    %112 = vector.load %arg8[%c0_43, %c0_44] : memref<8x16xf32, #tpu.memory_space<vmem>>, vector<8x16xf32>
    %cst_45 = arith.constant dense<0.000000e+00> : vector<8x128xf32>
    %113 = tpu.matmul %112, %111, %cst_45 {dimension_numbers = #tpu.dot_dimension_numbers<[1], [0], [0], [1], [0, 0, 1, 1], [], []>} : vector<8x16xf32>, vector<16x128xf32>, vector<8x128xf32> -> vector<8x128xf32>
    %c0_46 = arith.constant 0 : index
    %c0_47 = arith.constant 0 : index
    %114 = vector.load %arg9[%c0_46, %c0_47] : memref<8x1xf32, #tpu.memory_space<vmem>>, vector<8x1xf32>
    %115 = vector.broadcast %114 : vector<8x1xf32> to vector<8x128xf32>
    %116 = arith.addf %113, %115 : vector<8x128xf32>
    %cst_48 = arith.constant 0.000000e+00 : f32
    %117 = vector.broadcast %cst_48 : f32 to vector<8x128xf32>
    %118 = arith.maximumf %116, %117 : vector<8x128xf32>
    %119 = arith.addf %118, %62 : vector<8x128xf32>
    %cst_49 = arith.constant 0.000000e+00 : f32
    %120 = vector.broadcast %cst_49 : f32 to vector<8x128xf32>
    %121 = arith.maximumf %119, %120 : vector<8x128xf32>
    %c0_50 = arith.constant 0 : index
    %c0_51 = arith.constant 0 : index
    %122 = vector.load %arg10[%c0_50, %c0_51] : memref<8x128xf32, #tpu.memory_space<vmem>>, vector<8x128xf32>
    tpu.vector_store %arg10[%c0_50, %c0_51], %121 {strides = array<i32>} : memref<8x128xf32, #tpu.memory_space<vmem>>, vector<8x128xf32>,
    return
  }
  func.func @transform_0(%arg0: i32) -> (i32, i32) {
    %c0_i32 = arith.constant 0 : i32
    %c0_i32_0 = arith.constant 0 : i32
    return %c0_i32, %arg0 : i32, i32
  }
  func.func @transform_1(%arg0: i32) -> (i32, i32) {
    %c0_i32 = arith.constant 0 : i32
    %c0_i32_0 = arith.constant 0 : i32
    %c0_i32_1 = arith.constant 0 : i32
    return %c0_i32, %c0_i32_0 : i32, i32
  }
  func.func @transform_2(%arg0: i32) -> (i32, i32) {
    %c0_i32 = arith.constant 0 : i32
    %c0_i32_0 = arith.constant 0 : i32
    %c0_i32_1 = arith.constant 0 : i32
    return %c0_i32, %c0_i32_0 : i32, i32
  }
  func.func @transform_3(%arg0: i32) -> (i32, i32) {
    %c0_i32 = arith.constant 0 : i32
    %c0_i32_0 = arith.constant 0 : i32
    %c0_i32_1 = arith.constant 0 : i32
    return %c0_i32, %c0_i32_0 : i32, i32
  }
  func.func @transform_4(%arg0: i32) -> (i32, i32) {
    %c0_i32 = arith.constant 0 : i32
    %c0_i32_0 = arith.constant 0 : i32
    %c0_i32_1 = arith.constant 0 : i32
    return %c0_i32, %c0_i32_0 : i32, i32
  }
  func.func @transform_5(%arg0: i32) -> (i32, i32) {
    %c0_i32 = arith.constant 0 : i32
    %c0_i32_0 = arith.constant 0 : i32
    %c0_i32_1 = arith.constant 0 : i32
    return %c0_i32, %c0_i32_0 : i32, i32
  }
  func.func @transform_6(%arg0: i32) -> (i32, i32) {
    %c0_i32 = arith.constant 0 : i32
    %c0_i32_0 = arith.constant 0 : i32
    %c0_i32_1 = arith.constant 0 : i32
    return %c0_i32, %c0_i32_0 : i32, i32
  }
  func.func @transform_7(%arg0: i32) -> (i32, i32) {
    %c0_i32 = arith.constant 0 : i32
    %c0_i32_0 = arith.constant 0 : i32
    %c0_i32_1 = arith.constant 0 : i32
    return %c0_i32, %c0_i32_0 : i32, i32
  }
  func.func @transform_8(%arg0: i32) -> (i32, i32) {
    %c0_i32 = arith.constant 0 : i32
    %c0_i32_0 = arith.constant 0 : i32
    %c0_i32_1 = arith.constant 0 : i32
    return %c0_i32, %c0_i32_0 : i32, i32
  }
  func.func @transform_9(%arg0: i32) -> (i32, i32) {
    %c0_i32 = arith.constant 0 : i32
    %c0_i32_0 = arith.constant 0 : i32
    return %c0_i32, %arg0 : i32, i32
  }
}

</mosaic_0001>

<bundles_post_ra>
// kernel: tpu_custom_call.1
= control target key start
LH: loop header
LB: loop body
LE: loop exit
PB: predicated region body
PF: predicated region fallthrough
CT: control target
= control target key end

     0   :  { %14 = vsyncpa [#allocation3], 0  ;;  %s1171_s0 = inlined_call_operand.vmem [shape: f32[4,256], index: 0, kind: input, shape index: {}]   ;;  %s1172_s1 = inlined_call_operand.vmem [shape: f32[16,8], index: 1, kind: input, shape index: {}]   ;;  %s1173_s2 = inlined_call_operand.vmem [shape: f32[16,1], index: 2, kind: input, shape index: {}]   ;;  %s1174_s3 = inlined_call_operand.vmem [shape: f32[8,16], index: 3, kind: input, shape index: {}]   ;;  %s1175_s4 = inlined_call_operand.vmem [shape: f32[8,1], index: 4, kind: input, shape index: {}]   ;;  %s1176_s5 = inlined_call_operand.vmem [shape: f32[8,16], index: 5, kind: input, shape index: {}]   ;;  %s1177_s6 = inlined_call_operand.vmem [shape: f32[8,1], index: 6, kind: input, shape index: {}]   ;;  %s1178_s7 = inlined_call_operand.vmem [shape: f32[8,16], index: 7, kind: input, shape index: {}]   ;;  %s1179_s8 = inlined_call_operand.vmem [shape: f32[8,1], index: 8, kind: input, shape index: {}]   ;;  %s1180_s9 = inlined_call_operand.hbm [shape: f32[8,256], index: 9, kind: output, shape index: {}]  }
   0x1   :  { %16 = vsyncpa [#allocation3 + $0x1], 0  ;;  %s1017_s30 = smov 0   ;;  %s1019_s10 = smov 0  }
   0x2   :  { %s1021_s11 = smov 0   ;;  %s1023_s12 = smov 0  }
   0x3 LB: > { %s1038_s13 = sadd.s32 4294967295, %s959_s12   ;;  %s800_s14 = sadd.s32 4294967294, %s959_s12   ;;  %s959_s12 = sphi %s1023_s12, %s1186_s12   ;;  %s955_s11 = sphi %s1021_s11, %s1185_s11   ;;  %s951_s10 = sphi %s1019_s10, %s1184_s10   ;;  %s947_s30 = sphi %s1017_s30, %s1183_s30  }
   0x4   : > { %s1042_s15 = sadd.s32 1, %s959_s12   ;;  %s223_s16 = sadd.s32 1, %s955_s11 }
   0x5   : > { %s220_s17 = ssub.s32 %s959_s12, %s1042_s15  ;;  %p233_p0 = scmp.ne.s32.totalorder %s955_s11, %s951_s10 }
   0x6   : > { %p221_p1 = scmp.eq.s32.totalorder %s220_s17, 0  ;;  %p234_p2 = scmp.eq.s32.totalorder %s1038_s13, 1 }
   0x7   : > { %p239_p3 = scmp.ne.s32.totalorder %s951_s10, %s947_s30  ;;  %p240_p4 = scmp.eq.s32.totalorder %s800_s14, 1 }
   0x8   : > { %s1053_s18 = scalar_select %p221_p1, %s955_s11, %s223_s16  }
   0x9   : > { %p1055_p5 = por %p234_p2, %p233_p0  ;;  %p1059_p6 = por %p240_p4, %p239_p3 }
   0xa   : > { %p803_p7 = scmp.ge.s32.totalorder %s959_s12, 1  ;;  %p289_p8 = scmp.lt.s32.totalorder %s959_s12, 3 }
   0xc   : > { %p290_p9 = pnand %p803_p7, %p289_p8 }
   0xd   : > { %p324_p10 = scmp.lt.s32.totalorder (!%p290_p9), %s1038_s13, 1  ;;  %s962_s28 = smov (!%p290_p9), 1  }
   0xe   : > { %293 = sbr.rel (%p290_p9) target bundleno = 1313 (0x521), region = 56  ;;  %s812_s26 = sshll.u32 (!%p290_p9), %s1038_s13, 7 }
   0xf   : > { %s739_s17 = scalar_lea.hbm (!%p290_p9), %s1180_s9, %s812_s26 }
  0x13   : > { %v358_v0 = vld [vmem:[%s1172_s1] sm:$0xff]  ;;  %vm372_vm0 = vcmask 64512   ;;  %s325_s23 = scalar_select %p324_p10, %s1038_s13, 1  ;;  %v961_v1 = vmov 0   ;;  %v328_v4 = vlaneseq  ;;  %vm356_vm3 = vcmask 1043456   ;;  %v359_v12 = vld [vmem:[%s1172_s1 + $0x8] sm:$0xff] }
  0x14   : > { %829 = vmatprep.mubr.msk.f32.mxu0 %vm372_vm0, %v358_v0  ;;  %897 = vset.pattern.permute.xlu0 %v961_v1  ;;  %v360_v3 = vld [vmem:[%s1173_s2] sm:$0xff]  ;;  %v963_v13 = vmov 0.0   ;;  %vm964_vm4 = vmmov 0   ;;  %v361_v20 = vld [vmem:[%s1173_s2 + $0x8] sm:$0xff]  ;;  %vm466_vm5 = vcmask 130048  }
  0x15   : > { %898 = vset.pattern.permute.xlu1 %v961_v1  ;;  %s805_s24 = sshll.u32 %s325_s23, 2  ;;  %v329_v5 = vand.u32 127, %v328_v4  ;;  %832 = vmatprep.subr.mxu1 %v963_v13  ;;  %v460_v19 = vld [vmem:[%s1175_s4] sm:$0xff]  ;;  %s966_s23 = smov [#allocation2]  }
  0x16   : > { %s327_s27 = scalar_lea.vmem %s1171_s0, %s805_s24  ;;  %836 = vmatprep.mubr.msk.f32.mxu1 %vm964_vm4, %v963_v13  ;;  %v459_v23 = vld [vmem:[%s1174_s3] sm:$0xff]  ;;  %s903_s24 = sshll.u32 %s966_s23, 4  ;;  %s904_s24 = int_to_ptr.vmem [resolvable:$false] %s903_s24 }
  0x17   : > { %v342_v2 = vld [vmem:[%s327_s27] sm:$0xf]  ;;  %v1078_v6 = vand.u32 15, %v329_v5  ;;  %s965_s27 = smov 2   ;;  %s905_s13 = scalar_lea.vmem %s904_s24, 256 }
  0x18   : > { %348 = vrot.lane.b32.xlu0 %v342_v2, %s962_s28  ;;  %v354_v7 = vrot.slane %v342_v2, 4  ;;  %v555_v35 = vld [vmem:[%s1177_s6] sm:$0xff] }
  0x19   : > { %vm343_vm1 = vcmp.eq.s32.totalorder %v1078_v6, 0  ;;  %vm347_vm2 = vcmp.ge.s32.totalorder %v1078_v6, 1  ;;  %vm548_vm6 = vcmp.ge.s32.totalorder %v1078_v6, 2  ;;  %v554_v40 = vld [vmem:[%s1176_s5] sm:$0xff] }
  0x1a   : > { %v346_v8 = vsel %vm343_vm1, %v342_v2, 0.0  ;;  %v644_v48 = vld [vmem:[%s1179_s8] sm:$0xff] }
  0x1b   : > { %v643_v53 = vld [vmem:[%s1178_s7] sm:$0xff] }
  0x1c   : > { %364 = vperm.xlu0 %897, %v360_v3  }
  0x8a   : > { %v349_v9 = vpop.permute.xlu0 %348 }
  0x8b   : > { %v352_v10 = vsel %vm347_vm2, %v349_v9, %v346_v8 }
  0x8c   : > { %v357_v11 = vsel %vm356_vm3, %v352_v10, %v354_v7 }
  0x8d   : > { %827 = vmatprep.subr.mxu0 %v357_v11 }
  0x8e   : > { %828 = vmatpush3.msra.mxu0 %v357_v11 }
  0x8f   : > { %830 = vmatmul.mubr.msk.f32.vlgmr.msra.gmra.mxu0 %vm372_vm0, %v359_v12  ;;  %839 = vmatprep.subr.mxu0 %v963_v13 }
  0x90   : > { %843 = vmatprep.mubr.msk.f32.mxu0 %vm964_vm4, %v963_v13 }
  0x97   : > { %v365_v15 = vpop.permute.xlu0 %364 }
 0x14f   : > { %v831_v14 = vpop.f32.mrf.mxu0 }
 0x151   : > { %v445_v16 = vpop.f32.mrf.mxu0 }
 0x152   : > { %v446_v17 = vadd.f32 %v445_v16, %v365_v15 }
 0x154   : > { %v454_v18 = vmax.f32 %v446_v17, 0.0 }
 0x156   : > { %456 = vrot.lane.b32.xlu1 %v454_v18, %s962_s28  ;;  %833 = vmatpush3.msra.mxu1 %v454_v18  ;;  %v455_v22 = vsel %vm343_vm1, %v454_v18, 0.0 }
 0x157   : > { %834 = vmatprep.subr.mxu1 %v963_v13 }
 0x15a   : > { %463 = vperm.xlu1 %898, %v460_v19  }
 0x15e   : > { %369 = vperm.xlu1 %898, %v361_v20  }
 0x1c8   : > { %v457_v21 = vpop.permute.xlu1 %456 }
 0x1c9   : > { %v458_v24 = vsel %vm347_vm2, %v457_v21, %v455_v22 }
 0x1ca   : > { %835 = vmatpush3.msra.mxu1 %v458_v24 }
 0x1cb   : > { %837 = vmatmul.mubr.msk.f32.vlgmr.msra.gmra.mxu1 %vm466_vm5, %v459_v23  ;;  %846 = vmatprep.subr.mxu1 %v963_v13 }
 0x1cc   : > { %850 = vmatprep.mubr.msk.f32.mxu1 %vm964_vm4, %v963_v13 }
 0x1d5   : > { %v464_v25 = vpop.permute.xlu1 %463 }
 0x1d9   : > { %v370_v26 = vpop.permute.xlu1 %369 }
 0x1da   : > { %v451_v30 = vadd.f32 %v831_v14, %v370_v26 }
 0x28b   : > { %v536_v27 = vpop.f32.mrf.mxu1 }
 0x28c   : > { %v537_v28 = vadd.f32 %v536_v27, %v464_v25 }
 0x28d   : > { %v838_v29 = vpop.f32.mrf.mxu1 }
 0x28e   : > { %v540_v31 = vmax.f32 %v537_v28, 0.0 }
 0x290   : > { %v541_v32 = vadd.f32 %v540_v31, %v451_v30 }
 0x292   : > { %v542_v33 = vmax.f32 %v541_v32, 0.0 }
 0x294   : > { %549 = vrot.lane.b32.xlu1 %v542_v33, %s965_s27  ;;  %840 = vmatpush3.msra.mxu0 %v542_v33  ;;  %v543_v34 = vsel %vm343_vm1, %v542_v33, 0.0 }
 0x295   : > { %544 = vrot.lane.b32.xlu0 %v543_v34, %s962_s28  ;;  %841 = vmatprep.subr.mxu0 %v963_v13 }
 0x299   : > { %558 = vperm.xlu0 %897, %v555_v35  }
 0x306   : > { %v550_v39 = vpop.permute.xlu1 %549 }
 0x307   : > { %v545_v36 = vpop.permute.xlu0 %544 }
 0x308   : > { %v546_v37 = vsel %vm347_vm2, %v545_v36, 0.0 }
 0x309   : > { %v547_v38 = vadd.f32 %v546_v37, %v543_v34 }
 0x30b   : > { %v553_v41 = vsel %vm548_vm6, %v550_v39, %v547_v38 }
 0x30c   : > { %842 = vmatpush3.msra.mxu0 %v553_v41 }
 0x30d   : > { %844 = vmatmul.mubr.msk.f32.vlgmr.msra.gmra.mxu0 %vm466_vm5, %v554_v40 }
 0x314   : > { %v559_v42 = vpop.permute.xlu0 %558 }
 0x3cd   : > { %v630_v43 = vpop.f32.mrf.mxu0 }
 0x3ce   : > { %v631_v44 = vadd.f32 %v630_v43, %v559_v42 }
 0x3cf   : > { %v845_v45 = vpop.f32.mrf.mxu0 }
 0x3d0   : > { %v634_v46 = vmax.f32 %v631_v44, 0.0 }
 0x3d2   : > { %640 = vrot.lane.b32.xlu0 %v634_v46, %s965_s27  ;;  %847 = vmatpush3.msra.mxu1 %v634_v46  ;;  %v635_v47 = vsel %vm343_vm1, %v634_v46, 0.0 }
 0x3d3   : > { %636 = vrot.lane.b32.xlu1 %v635_v47, %s962_s28  ;;  %848 = vmatprep.subr.mxu1 %v963_v13  ;;  %s321_s28 = sand.u32 1, %s951_s10  }
 0x3d4   : > { %s804_s25 = sshll.u32 %s321_s28, 3  ;;  %s728_s21 = scalar_lea.sflag [#allocation3], %s321_s28 }
 0x3d5   : > { %s323_s27 = scalar_lea.vmem [#allocation2], %s804_s25 }
 0x3d6   : > { %s741_s29 = sshll.u32 %s323_s27, 4  ;;  %s742_s29 = int_to_ptr.vmem [resolvable:$true] %s741_s29 }
 0x3d7   : > { %647 = vperm.xlu1 %898, %v644_v48   ;;  %s899_s22 = scalar_lea.vmem %s742_s29, 128  ;;  %p906_p0 = scmp.lt.s32.totalorder %s742_s29, %s904_s24 }
 0x3d8   : > { %p900_p11 = scmp.ne.s32.totalorder %s742_s29, %s899_s22  ;;  %p907_p1 = scmp.lt.s32.totalorder %s905_s13, %s899_s22 }
 0x3da   : > { %p901_p12 = pnand %p900_p11, %p1055_p5  ;;  %p908_p2 = por %p907_p1, %p906_p0 }
 0x3dc   : > { %p902_p13 = pneg %p901_p12 }
 0x3de   : > { %p909_p3 = pnand %p908_p2, %p902_p13 }
 0x444   : > { %v641_v52 = vpop.permute.xlu0 %640 }
 0x445   : > { %v637_v49 = vpop.permute.xlu1 %636 }
 0x446   : > { %v638_v50 = vsel %vm347_vm2, %v637_v49, 0.0 }
 0x447   : > { %v639_v51 = vadd.f32 %v638_v50, %v635_v47 }
 0x449   : > { %v642_v54 = vsel %vm548_vm6, %v641_v52, %v639_v51 }
 0x44a   : > { %849 = vmatpush3.msra.mxu1 %v642_v54 }
 0x44b   : > { %851 = vmatmul.mubr.msk.f32.vlgmr.msra.gmra.mxu1 %vm466_vm5, %v643_v53 }
 0x452   : > { %v648_v55 = vpop.permute.xlu1 %647 }
 0x50b   : > { %v719_v56 = vpop.f32.mrf.mxu1 }
 0x50c   : > { %v720_v57 = vadd.f32 %v719_v56, %v648_v55 }
 0x50d   : > { %v852_v58 = vpop.f32.mrf.mxu1 }
 0x50e   : > { %v723_v59 = vmax.f32 %v720_v57, 0.0 }
 0x510   : > { %v724_v60 = vadd.f32 %v723_v59, %v542_v33 }
 0x512   : > { %v725_v61 = vmax.f32 %v724_v60, 0.0 }
 0x514   : > { %726 = vst [vmem:[%s323_s27] sm:$0xff] %v725_v61 }
 0x515   : > { %912 = shalt.err (!%p909_p3)
}
 0x516   : > { %s913_s25 = scalar_lea.hbm %s739_s17, 128  ;;  %s917_s27 = scalar_lea.hbm %s1180_s9, 256 }
 0x517   : > { %p914_p4 = scmp.ne.s32.totalorder %s739_s17, %s913_s25  ;;  %p918_p9 = scmp.lt.s32.totalorder %s739_s17, %s1180_s9 }
 0x518   : > { %p919_p10 = scmp.lt.s32.totalorder %s917_s27, %s913_s25 }
 0x519   : > { %p915_p7 = pnand %p914_p4, %p1055_p5 }
 0x51a   : > { %p920_p11 = por %p919_p10, %p918_p9 }
 0x51b   : > { %p916_p8 = pneg %p915_p7 }
 0x51d   : > { %p921_p12 = pnand %p920_p11, %p916_p8 }
 0x51f   : > { %924 = shalt.err (!%p921_p12)
}
 0x520   : > { %853 = dma.vmem_to_hbm [thread:$0]  (%p1055_p5), %s742_s29, 128, %s739_s17, %s728_s21  }
 0x521 PF: > { %p859_p13 = scmp.ge.s32.totalorder %s959_s12, 2  ;;  %s753_s22 = sand.u32 1, %s947_s30  }
 0x522   : > { %s754_s23 = scalar_lea.sflag [#allocation3], %s753_s22 }
 0x523   : > { %p856_p0 = pnand %p859_p13, %p1059_p6 }
 0x525   : > { %p857_p1 = pneg %p856_p0 }
 0x527   : > { %942 = dma.done.wait (%p857_p1), %s754_s23, 128  }
 0x528   : > { %944 = vsyncadd (%p857_p1), %s754_s23, 4294967168  ;;  %p19_p2 = scmp.ge.s32.totalorder %s1042_s15, 4   ;;  %s1183_s30 = smov %s951_s10 }
 0x529   : > { %s1184_s10 = smov %s955_s11  ;;  %s1185_s11 = smov %s1053_s18 }
 0x52a   : > { %s1186_s12 = smov %s1042_s15  ;;  %21 = sbr.rel (!%p19_p2) target bundleno = 3 (0x3), region = 91 }
 0x52f   :  { %759 = vsyncpa [#allocation3], 1 }
 0x530   :  { %761 = vsyncpa [#allocation3 + $0x1], 1 }

</bundles_post_ra>
